<compile_context>
chip_gen: v7x
topology: tpu7x:2x2x1
jax: 0.10.0
libtpu: 0.0.40
codegen_flags: <defaults>
</compile_context>

<pallas_src>
import math
from functools import partial

import numpy as np
import jax
import jax.numpy as jnp
from jax.experimental import pallas as pl
from jax.experimental.pallas import tpu as pltpu

F32 = jnp.float32
BF16 = jnp.bfloat16
BN_EPS = 1e-5
LN_EPS = 1e-5

_ROW_TILE_MM = 512            # row tile for matmul-style kernels
_ROW_TILE_EW = 1024           # row tile for elementwise / normalization kernels
_ROW_TILE_SPC = 1024          # row tile for the tap-accumulating spconv path
_FOLD_LIMIT = 27 * 192        # fold taps into the contraction when K*Ci <= this
_VMEM_LIMIT = 48 * 1024 * 1024


def _choose_tm(M, cap):
    # full-array block for small M (exact dims always legal); capped tile else.
    return M if M <= cap else cap


def _cparams(*sems):
    return pltpu.CompilerParams(dimension_semantics=sems,
                                vmem_limit_bytes=_VMEM_LIMIT)


# -----------------------------------------------------------------------------
# Pallas kernels
# -----------------------------------------------------------------------------
def _mm_bias_kernel(x_ref, w_ref, b_ref, o_ref):
    acc = jnp.dot(x_ref[...].astype(BF16), w_ref[...],
                  preferred_element_type=jnp.float32)
    o_ref[...] = (acc + b_ref[...]).astype(o_ref.dtype)


def _mm_bias_res_kernel(x_ref, w_ref, b_ref, r_ref, o_ref):
    acc = jnp.dot(x_ref[...].astype(BF16), w_ref[...],
                  preferred_element_type=jnp.float32)
    o_ref[...] = (acc + b_ref[...]
                  + r_ref[...].astype(jnp.float32)).astype(o_ref.dtype)


def _film_scale_shift(bidx_ref, ts_ref, tt_ref):
    # per-row FiLM scale/shift selected from a tiny [nbatch, nf] table via a
    # one-hot matmul (MXU) instead of an unrolled broadcast/select loop.
    nb = ts_ref.shape[0]
    onehot = (bidx_ref[...] ==
              jax.lax.broadcasted_iota(jnp.int32,
                                       (bidx_ref.shape[0], nb), 1)
              ).astype(jnp.float32)
    scale = jnp.dot(onehot, ts_ref[...], preferred_element_type=jnp.float32)
    shift = jnp.dot(onehot, tt_ref[...], preferred_element_type=jnp.float32)
    return scale, shift


def _mm_film_kernel(x_ref, w_ref, bidx_ref, ts_ref, tt_ref, o_ref):
    acc = jnp.dot(x_ref[...].astype(BF16), w_ref[...],
                  preferred_element_type=jnp.float32)
    scale, shift = _film_scale_shift(bidx_ref, ts_ref, tt_ref)
    o_ref[...] = (acc * (1.0 + scale) + shift).astype(o_ref.dtype)


def _spconv_accum_kernel(g_ref, w_ref, o_ref, acc_ref):
    # grid = (M tiles ["parallel"], K taps ["arbitrary" reduction, innermost]).
    # w_ref holds the full [K, Ci, Co] weight (VMEM-resident, fetched once).
    k = pl.program_id(1)

    @pl.when(k == 0)
    def _():
        acc_ref[...] = jnp.zeros_like(acc_ref)

    acc_ref[...] += jnp.dot(g_ref[0], w_ref[k],
                            preferred_element_type=jnp.float32)

    @pl.when(k == pl.num_programs(1) - 1)
    def _():
        o_ref[...] = acc_ref[...].astype(o_ref.dtype)


def _spconv_res_kernel(g_ref, w_ref, r_ref, o_ref, acc_ref):
    k = pl.program_id(1)

    @pl.when(k == 0)
    def _():
        acc_ref[...] = jnp.zeros_like(acc_ref)

    acc_ref[...] += jnp.dot(g_ref[0], w_ref[k],
                            preferred_element_type=jnp.float32)

    @pl.when(k == pl.num_programs(1) - 1)
    def _():
        o_ref[...] = (acc_ref[...]
                      + r_ref[...].astype(jnp.float32)).astype(o_ref.dtype)


def _spconv_film_kernel(g_ref, w_ref, bidx_ref, ts_ref, tt_ref, o_ref, acc_ref):
    k = pl.program_id(1)

    @pl.when(k == 0)
    def _():
        acc_ref[...] = jnp.zeros_like(acc_ref)

    acc_ref[...] += jnp.dot(g_ref[0], w_ref[k],
                            preferred_element_type=jnp.float32)

    @pl.when(k == pl.num_programs(1) - 1)
    def _():
        scale, shift = _film_scale_shift(bidx_ref, ts_ref, tt_ref)
        o_ref[...] = (acc_ref[...] * (1.0 + scale) + shift).astype(o_ref.dtype)


def _affine_silu_kernel(x_ref, ss_ref, o_ref):
    ss = ss_ref[...]
    h = x_ref[...].astype(jnp.float32) * ss[0:1, :] + ss[1:2, :]
    o_ref[...] = (h * jax.nn.sigmoid(h)).astype(o_ref.dtype)


def _affine_silu_linear_kernel(x_ref, ss_ref, w_ref, b_ref, o_ref):
    ss = ss_ref[...]
    h = x_ref[...].astype(jnp.float32) * ss[0:1, :] + ss[1:2, :]
    h = h * jax.nn.sigmoid(h)
    acc = jnp.dot(h.astype(BF16), w_ref[...],
                  preferred_element_type=jnp.float32)
    o_ref[...] = (acc + b_ref[...]).astype(o_ref.dtype)


def _bn_stats_kernel(x_ref, g_ref, b_ref, o_ref, sum_ref, sq_ref, *,
                     m_total, tm):
    # single-pass batch-norm statistics (sum / sum-of-squares), row-masked for
    # the ragged last tile; finalize emits the folded (scale, shift) table.
    i = pl.program_id(0)

    @pl.when(i == 0)
    def _():
        sum_ref[...] = jnp.zeros_like(sum_ref)
        sq_ref[...] = jnp.zeros_like(sq_ref)

    x = x_ref[...].astype(jnp.float32)
    rows = jax.lax.broadcasted_iota(jnp.int32, x.shape, 0) + i * tm
    xv = jnp.where(rows < m_total, x, 0.0)
    sum_ref[...] += jnp.sum(xv, axis=0, keepdims=True)
    sq_ref[...] += jnp.sum(xv * xv, axis=0, keepdims=True)

    @pl.when(i == pl.num_programs(0) - 1)
    def _():
        mu = sum_ref[...] / m_total
        var = jnp.maximum(sq_ref[...] / m_total - mu * mu, 0.0)
        scale = g_ref[...] * jax.lax.rsqrt(var + BN_EPS)
        shift = b_ref[...] - mu * scale
        o_ref[...] = jnp.concatenate([scale, shift], axis=0)


def _layernorm_kernel(x_ref, g_ref, b_ref, o_ref):
    x = x_ref[...].astype(jnp.float32)
    mu = jnp.mean(x, axis=-1, keepdims=True)
    var = jnp.mean((x - mu) ** 2, axis=-1, keepdims=True)
    o_ref[...] = ((x - mu) * jax.lax.rsqrt(var + LN_EPS) * g_ref[...]
                  + b_ref[...]).astype(o_ref.dtype)


def _attn_kernel(qkv_ref, m_ref, o_ref, *, nheads, d, nf, scale):
    # One batch per grid point; qkv is a lane-dense (1, S, 3*nf) slab.
    # Heads are static lane slices of width d; output is one dense store.
    bias = (m_ref[0].astype(jnp.float32) - 1.0) * 1e30          # (1, S)
    outs = []
    for h in range(nheads):
        q = qkv_ref[0, :, h * d:(h + 1) * d]
        k = qkv_ref[0, :, nf + h * d:nf + (h + 1) * d]
        v = qkv_ref[0, :, 2 * nf + h * d:2 * nf + (h + 1) * d]
        s = jax.lax.dot_general(q, k, (((1,), (1,)), ((), ())),
                                preferred_element_type=jnp.float32) * scale
        s = s + bias
        s = s - jnp.max(s, axis=-1, keepdims=True)
        p = jnp.exp(s)
        p = p * pl.reciprocal(jnp.sum(p, axis=-1, keepdims=True), approx=True)
        outs.append(jnp.dot(p.astype(BF16), v,
                            preferred_element_type=jnp.float32))
    o_ref[0] = jnp.concatenate(outs, axis=-1).astype(o_ref.dtype)


# -----------------------------------------------------------------------------
# Pallas wrappers (row-tiled, software-pipelined)
# -----------------------------------------------------------------------------
def pallas_matmul(x, w, b=None, res=None, film=None, out_dtype=BF16):
    """x @ w (+ bias) with optional fused FiLM or fused residual epilogue."""
    M, K = x.shape
    N = w.shape[1]
    tm = _choose_tm(M, _ROW_TILE_MM)
    grid = (pl.cdiv(M, tm),)
    x_spec = pl.BlockSpec((tm, K), lambda i: (i, 0))
    w_spec = pl.BlockSpec((K, N), lambda i: (0, 0))
    o_spec = pl.BlockSpec((tm, N), lambda i: (i, 0))
    out_shape = jax.ShapeDtypeStruct((M, N), out_dtype)

    if film is not None:
        b_idx, ts, tt = film
        nb = ts.shape[0]
        return pl.pallas_call(
            _mm_film_kernel,
            out_shape=out_shape, grid=grid,
            in_specs=[x_spec, w_spec,
                      pl.BlockSpec((tm, 1), lambda i: (i, 0)),
                      pl.BlockSpec((nb, N), lambda i: (0, 0)),
                      pl.BlockSpec((nb, N), lambda i: (0, 0))],
            out_specs=o_spec,
            compiler_params=_cparams("parallel"),
        )(x, w, b_idx, ts, tt)

    bb = jnp.zeros((1, N), F32) if b is None else b.reshape(1, N).astype(F32)
    if res is not None:
        return pl.pallas_call(
            _mm_bias_res_kernel,
            out_shape=out_shape, grid=grid,
            in_specs=[x_spec, w_spec,
                      pl.BlockSpec((1, N), lambda i: (0, 0)),
                      pl.BlockSpec((tm, N), lambda i: (i, 0))],
            out_specs=o_spec,
            compiler_params=_cparams("parallel"),
        )(x, w, bb, res)

    return pl.pallas_call(
        _mm_bias_kernel,
        out_shape=out_shape, grid=grid,
        in_specs=[x_spec, w_spec, pl.BlockSpec((1, N), lambda i: (0, 0))],
        out_specs=o_spec,
        compiler_params=_cparams("parallel"),
    )(x, w, bb)


def pallas_spconv(gathered, w, film=None, res=None, out_dtype=BF16):
    """gathered: [K, M, Ci] bf16; w: [K, Ci, Co] bf16 (VMEM-resident) -> [M, Co]."""
    K, M, Ci = gathered.shape
    Co = w.shape[2]
    tm = _choose_tm(M, _ROW_TILE_SPC)
    grid = (pl.cdiv(M, tm), K)
    g_spec = pl.BlockSpec((1, tm, Ci), lambda i, k: (k, i, 0))
    w_spec = pl.BlockSpec((K, Ci, Co), lambda i, k: (0, 0, 0))     # resident
    o_spec = pl.BlockSpec((tm, Co), lambda i, k: (i, 0))
    common = dict(out_shape=jax.ShapeDtypeStruct((M, Co), out_dtype),
                  grid=grid, out_specs=o_spec,
                  scratch_shapes=[pltpu.VMEM((tm, Co), jnp.float32)],
                  compiler_params=_cparams("parallel", "arbitrary"))

    if film is not None:
        b_idx, ts, tt = film
        nb = ts.shape[0]
        return pl.pallas_call(
            _spconv_film_kernel,
            in_specs=[g_spec, w_spec,
                      pl.BlockSpec((tm, 1), lambda i, k: (i, 0)),
                      pl.BlockSpec((nb, Co), lambda i, k: (0, 0)),
                      pl.BlockSpec((nb, Co), lambda i, k: (0, 0))],
            **common)(gathered, w, b_idx, ts, tt)
    if res is not None:
        return pl.pallas_call(
            _spconv_res_kernel,
            in_specs=[g_spec, w_spec,
                      pl.BlockSpec((tm, Co), lambda i, k: (i, 0))],
            **common)(gathered, w, res)
    return pl.pallas_call(
        _spconv_accum_kernel,
        in_specs=[g_spec, w_spec],
        **common)(gathered, w)


def pallas_affine_silu(x, ss, out_dtype=BF16):
    M, C = x.shape
    tm = _choose_tm(M, _ROW_TILE_EW)
    return pl.pallas_call(
        _affine_silu_kernel,
        out_shape=jax.ShapeDtypeStruct((M, C), out_dtype),
        grid=(pl.cdiv(M, tm),),
        in_specs=[pl.BlockSpec((tm, C), lambda i: (i, 0)),
                  pl.BlockSpec((2, C), lambda i: (0, 0))],
        out_specs=pl.BlockSpec((tm, C), lambda i: (i, 0)),
        compiler_params=_cparams("parallel"),
    )(x, ss)


def pallas_affine_silu_linear(x, ss, w, b, out_dtype=F32):
    M, K = x.shape
    N = w.shape[1]
    tm = _choose_tm(M, _ROW_TILE_MM)
    bb = jnp.zeros((1, N), F32) if b is None else b.reshape(1, N).astype(F32)
    return pl.pallas_call(
        _affine_silu_linear_kernel,
        out_shape=jax.ShapeDtypeStruct((M, N), out_dtype),
        grid=(pl.cdiv(M, tm),),
        in_specs=[pl.BlockSpec((tm, K), lambda i: (i, 0)),
                  pl.BlockSpec((2, K), lambda i: (0, 0)),
                  pl.BlockSpec((K, N), lambda i: (0, 0)),
                  pl.BlockSpec((1, N), lambda i: (0, 0))],
        out_specs=pl.BlockSpec((tm, N), lambda i: (i, 0)),
        compiler_params=_cparams("parallel"),
    )(x, ss, w, bb)


def pallas_bn_fold(x, g, b):
    """Single-pass training-mode BatchNorm fold -> (2, C) [scale; shift]."""
    M, C = x.shape
    tm = _choose_tm(M, _ROW_TILE_EW)
    return pl.pallas_call(
        partial(_bn_stats_kernel, m_total=M, tm=tm),
        out_shape=jax.ShapeDtypeStruct((2, C), F32),
        grid=(pl.cdiv(M, tm),),
        in_specs=[pl.BlockSpec((tm, C), lambda i: (i, 0)),
                  pl.BlockSpec((1, C), lambda i: (0, 0)),
                  pl.BlockSpec((1, C), lambda i: (0, 0))],
        out_specs=pl.BlockSpec((2, C), lambda i: (0, 0)),
        scratch_shapes=[pltpu.VMEM((1, C), jnp.float32),
                        pltpu.VMEM((1, C), jnp.float32)],
        compiler_params=_cparams("arbitrary"),
    )(x, g.reshape(1, C).astype(F32), b.reshape(1, C).astype(F32))


def pallas_layernorm(x, g, b, out_dtype=BF16):
    M, C = x.shape
    tm = _choose_tm(M, _ROW_TILE_EW)
    return pl.pallas_call(
        _layernorm_kernel,
        out_shape=jax.ShapeDtypeStruct((M, C), out_dtype),
        grid=(pl.cdiv(M, tm),),
        in_specs=[pl.BlockSpec((tm, C), lambda i: (i, 0)),
                  pl.BlockSpec((1, C), lambda i: (0, 0)),
                  pl.BlockSpec((1, C), lambda i: (0, 0))],
        out_specs=pl.BlockSpec((tm, C), lambda i: (i, 0)),
        compiler_params=_cparams("parallel"),
    )(x, g.reshape(1, C).astype(F32), b.reshape(1, C).astype(F32))


def pallas_attention(qkv_p, mask, nheads, d, scale):
    # qkv_p: [B, S, 3*nf] bf16 (lane-dense), mask: [B, 1, S] f32 (1 = valid).
    B, S, three_nf = qkv_p.shape
    nf = three_nf // 3
    return pl.pallas_call(
        partial(_attn_kernel, nheads=nheads, d=d, nf=nf, scale=scale),
        out_shape=jax.ShapeDtypeStruct((B, S, nf), BF16),
        grid=(B,),
        in_specs=[pl.BlockSpec((1, S, 3 * nf), lambda b: (b, 0, 0)),
                  pl.BlockSpec((1, 1, S), lambda b: (b, 0, 0))],
        out_specs=pl.BlockSpec((1, S, nf), lambda b: (b, 0, 0)),
        compiler_params=_cparams("parallel"),
    )(qkv_p, mask)


# -----------------------------------------------------------------------------
# Small helpers (glue)
# -----------------------------------------------------------------------------
_IDENTITY_SS_CACHE = {}


def _identity_ss(C):
    if C not in _IDENTITY_SS_CACHE:
        _IDENTITY_SS_CACHE[C] = jnp.concatenate(
            [jnp.ones((1, C), F32), jnp.zeros((1, C), F32)], axis=0)
    return _IDENTITY_SS_CACHE[C]


def timestep_embedding(t, dim, max_period=10000):
    half = dim // 2
    freqs = jnp.exp(-math.log(max_period)
                    * jnp.arange(half, dtype=F32) / half)
    args = t.astype(F32)[:, None] * freqs[None, :]
    return jnp.concatenate([jnp.cos(args), jnp.sin(args)], axis=-1)


class SparseTensor:
    def __init__(self, F, C, stride):
        self.F = F            # jnp [M, ch]
        self.C = C            # np.int64 [M, 4] (x, y, z, batch)
        self.stride = stride


class PointTensor:
    def __init__(self, F, C, grid_coords=None):
        self.F = F                      # jnp [N, ch]
        self.C = C                      # jnp float [N, 4]
        self.grid_coords = grid_coords  # np.int64 [N, 4] at stride 1


def _hash_map(C):
    return {tuple(int(v) for v in row): i for i, row in enumerate(C)}


KS3_OFFSETS = [(dx, dy, dz) for dx in (-1, 0, 1) for dy in (-1, 0, 1)
               for dz in (-1, 0, 1)]
KS2_OFFSETS = [(dx, dy, dz) for dx in (0, 1) for dy in (0, 1) for dz in (0, 1)]


def build_kernel_map(out_C, in_hash, offsets, scale):
    K, M = len(offsets), out_C.shape[0]
    idx = np.full((K, M), -1, dtype=np.int32)
    for k, (dx, dy, dz) in enumerate(offsets):
        for m in range(M):
            key = (int(out_C[m, 0] + dx * scale),
                   int(out_C[m, 1] + dy * scale),
                   int(out_C[m, 2] + dz * scale),
                   int(out_C[m, 3]))
            idx[k, m] = in_hash.get(key, -1)
    return idx


# -----------------------------------------------------------------------------
# Deterministic parameter initialization (weights pre-cast to bf16 once)
# -----------------------------------------------------------------------------
class ParamGen:
    def __init__(self, seed=0):
        self.key = jax.random.PRNGKey(seed)

    def normal(self, shape, fan_in):
        self.key, k = jax.random.split(self.key)
        std = 1.0 / math.sqrt(max(fan_in, 1))
        return (std * jax.random.normal(k, shape)).astype(F32)

    def zeros(self, shape):
        return jnp.zeros(shape, F32)

    def ones(self, shape):
        return jnp.ones(shape, F32)


def init_linear(pg, ni, nf, bias=True):
    return {'w': pg.normal((ni, nf), ni).astype(BF16),
            'b': pg.normal((nf,), ni) if bias else None}


def init_bn(pg, c):
    return {'g': pg.ones((c,)), 'b': pg.zeros((c,))}


def init_conv3d(pg, ni, nf, ks):
    K = {1: 1, 2: 8, 3: 27}[ks]
    w = pg.normal((K, ni, nf), K * ni).astype(BF16)
    return {'w': w, 'w_flat': w.reshape(K * ni, nf), 'ks': ks}


def init_attn(pg, nf, attn_chans):
    return {'nheads': nf // attn_chans,
            'ln': init_bn(pg, nf),
            'qkv': init_linear(pg, nf, 3 * nf),
            'proj': init_linear(pg, nf, nf)}


def init_embres(pg, n_emb, ni, nf, attn_chans, ks=3):
    return {'bn1': init_bn(pg, ni), 'conv1': init_conv3d(pg, ni, nf, ks),
            'emb_proj': init_linear(pg, n_emb, 2 * nf),
            'bn2': init_bn(pg, nf), 'conv2': init_conv3d(pg, nf, nf, ks),
            'idconv': None if ni == nf else init_conv3d(pg, ni, nf, 1),
            'attn': init_attn(pg, nf, attn_chans) if attn_chans else None}


def init_pointblock(pg, ni, nf):
    return {'bn': init_bn(pg, ni), 'lin': init_linear(pg, ni, nf)}


def init_lin(pg, ni, nf, norm=False):
    return {'bn': init_bn(pg, ni) if norm else None,
            'lin': init_linear(pg, ni, nf)}


# -----------------------------------------------------------------------------
# Model
# -----------------------------------------------------------------------------
class SPVUnetSymmetricPallas:
    def __init__(self, point_channels=3, voxel_size=0.1,
                 blocks=[[(32, 64, 128, 192), (True, True, True),
                          (None, None, None), (3, 3, 3)],
                         [(192, 192, 256), (True, False), (8, 8), (3, 3)]],
                 num_layers=1, pres=1e-5, seed=0):
        self.pres = pres
        self.voxel_size = voxel_size
        self.n_temb = blocks[0][0][0]
        n_emb = self.n_temb * 4
        pg = ParamGen(seed)
        P = {}
        P['emb_mlp'] = [init_lin(pg, self.n_temb, n_emb, norm=True),
                        init_lin(pg, n_emb, n_emb, norm=False)]
        nf0 = blocks[0][0][0]
        P['stem'] = {'conv1': init_conv3d(pg, point_channels, nf0, 3),
                     'bn': init_bn(pg, nf0),
                     'conv2': init_conv3d(pg, nf0, nf0, 3),
                     'point': init_pointblock(pg, point_channels, nf0)}

        add_down_vals = []
        down_stages = []
        for nfs, add_down, attn_chans, _ in blocks:
            add_down_vals.extend(add_down)
            downs = []
            nf = nfs[0]
            for i in range(1, len(nfs)):
                ni, nf = nf, nfs[i]
                downs.append({
                    'resnets': [init_embres(pg, n_emb, ni, ni, attn_chans[i - 1])
                                for _ in range(num_layers)],
                    'down': (init_conv3d(pg, ni, nf, 2) if add_down[i - 1]
                             else init_conv3d(pg, ni, nf, 1)),
                    'add_down': add_down[i - 1]})
            down_stages.append({'downs': downs,
                                'point': init_pointblock(pg, nfs[0], nfs[-1])})
        P['down_stages'] = down_stages

        up_stages = []
        b_idx = 0
        for block_config in reversed(blocks):
            nfs, _, attn_chans, ks = [list(reversed(list(c)))
                                      for c in block_config]
            add_up = add_down_vals[b_idx:b_idx + len(attn_chans)]
            b_idx += len(attn_chans)
            ups = []
            prev_nf = nfs[0]
            for i in range(len(nfs) - 1):
                ni = nfs[i + 1]
                ups.append({
                    'resnets': [init_embres(pg, n_emb, prev_nf + ni, prev_nf,
                                            attn_chans[i], ks=ks[i])
                                for _ in range(num_layers + 1)],
                    'up': (init_conv3d(pg, prev_nf, ni, 2) if add_up[i]
                           else init_conv3d(pg, prev_nf, ni, 1)),
                    'add_up': add_up[i]})
                prev_nf = ni
            up_stages.append({'ups': ups,
                              'point': init_pointblock(pg, nfs[0], nfs[-1])})
        P['up_stages'] = up_stages
        P['out_conv'] = {'bn': init_bn(pg, nf0),
                         'lin': init_linear(pg, nf0, point_channels, bias=False)}
        self.params = P

    # ---------------- voxelization / point-voxel exchange ----------------
    def initial_voxelize(self, z):
        # TODO(synk): scatter-mean voxelization stays in XLA (.at[].add).
        c = np.asarray(z.C)
        gc = np.floor(c[:, :3] / self.voxel_size).astype(np.int64)
        b = c[:, 3].astype(np.int64)[:, None]
        grid_coords = np.concatenate([gc, b], axis=1)
        z.grid_coords = grid_coords
        out_C, inv = np.unique(grid_coords, axis=0, return_inverse=True)
        inv = np.asarray(inv).reshape(-1)
        self.coord_cache = {1: out_C}
        self.hash_cache = {1: _hash_map(out_C)}
        M = out_C.shape[0]
        counts = np.maximum(np.bincount(inv, minlength=M), 1).astype(np.float32)
        F = jnp.zeros((M, z.F.shape[1]), F32).at[jnp.asarray(inv)].add(z.F)
        F = F / jnp.asarray(counts)[:, None]
        return SparseTensor(F, out_C, 1)

    def _point_voxel_indices(self, z, stride):
        pc = (z.grid_coords[:, :3] // stride) * stride
        keys = np.concatenate([pc, z.grid_coords[:, 3:4]], axis=1)
        h = self.hash_cache[stride]
        return np.array([h[tuple(int(v) for v in row)] for row in keys],
                        dtype=np.int32)

    def voxel_to_point(self, x, z):
        idx = self._point_voxel_indices(z, x.stride)
        F = jnp.take(x.F, jnp.asarray(idx), axis=0)
        return PointTensor(F, z.C, z.grid_coords)

    def point_to_voxel(self, x, z1):
        idx = self._point_voxel_indices(z1, x.stride)
        M = x.C.shape[0]
        counts = np.maximum(np.bincount(idx, minlength=M), 1).astype(np.float32)
        Fv = jnp.zeros((M, z1.F.shape[1]), F32).at[jnp.asarray(idx)].add(
            z1.F.astype(F32))
        Fv = Fv / jnp.asarray(counts)[:, None]
        return SparseTensor(Fv, x.C, x.stride)

    # ---------------- sparse convolutions ----------------
    def _spconv_apply(self, F, idx, p, film=None, res=None):
        """F: [M, Ci]; idx: np.int32 [K, M] (-1 = missing); p: conv params."""
        K, M = idx.shape
        Ci = F.shape[1]
        zero_row = F.shape[0]
        # zero-row trick: missing neighbours gather an all-zero bf16 row
        F_ext = jnp.concatenate([F.astype(BF16), jnp.zeros((1, Ci), BF16)],
                                axis=0)
        idx_m = np.where(idx < 0, zero_row, idx).astype(np.int32)
        if K * Ci <= _FOLD_LIMIT:
            # Fold the tap axis into the contraction: a single
            # [M, K*Ci] x [K*Ci, Co] matmul (best MXU K-utilization).
            g = jnp.take(F_ext, jnp.asarray(idx_m.T.reshape(-1)), axis=0)
            g = g.reshape(M, K * Ci)
            return pallas_matmul(g, p['w_flat'], film=film, res=res)
        g = jnp.take(F_ext, jnp.asarray(idx_m.reshape(-1)), axis=0)
        g = g.reshape(K, M, Ci)
        return pallas_spconv(g, p['w'], film=film, res=res)

    def apply_spconv(self, p, x, film=None, res=None):
        if p['ks'] == 1:
            return SparseTensor(pallas_matmul(x.F, p['w_flat'],
                                              film=film, res=res),
                                x.C, x.stride)
        idx = build_kernel_map(x.C, self.hash_cache[x.stride],
                               KS3_OFFSETS, x.stride)
        return SparseTensor(self._spconv_apply(x.F, idx, p, film=film, res=res),
                            x.C, x.stride)

    def apply_down_conv(self, p, x):
        new_stride = x.stride * 2
        down = (x.C[:, :3] // new_stride) * new_stride
        out_C = np.unique(np.concatenate([down, x.C[:, 3:4]], axis=1), axis=0)
        self.coord_cache[new_stride] = out_C
        self.hash_cache[new_stride] = _hash_map(out_C)
        idx = build_kernel_map(out_C, self.hash_cache[x.stride],
                               KS2_OFFSETS, x.stride)
        return SparseTensor(self._spconv_apply(x.F, idx, p),
                            out_C, new_stride)

    def apply_up_conv(self, p, x):
        new_stride = x.stride // 2
        out_C = self.coord_cache[new_stride]
        in_hash = self.hash_cache[x.stride]
        M = out_C.shape[0]
        idx = np.full((8, M), -1, dtype=np.int32)
        for m in range(M):
            parent = (out_C[m, :3] // x.stride) * x.stride
            off = tuple(int(v) for v in ((out_C[m, :3] - parent) // new_stride))
            k = KS2_OFFSETS.index(off)
            key = (int(parent[0]), int(parent[1]), int(parent[2]),
                   int(out_C[m, 3]))
            idx[k, m] = in_hash.get(key, -1)
        return SparseTensor(self._spconv_apply(x.F, idx, p),
                            out_C, new_stride)

    # ---------------- sub-modules ----------------
    def apply_lin(self, p, x):
        C = x.shape[1]
        ss = (pallas_bn_fold(x, p['bn']['g'], p['bn']['b'])
              if p['bn'] is not None else _identity_ss(C))
        return pallas_affine_silu_linear(x, ss, p['lin']['w'], p['lin']['b'],
                                         out_dtype=F32)

    def apply_pointblock(self, p, z1, z):
        ss = pallas_bn_fold(z.F, p['bn']['g'], p['bn']['b'])
        delta = pallas_affine_silu_linear(z.F, ss, p['lin']['w'], p['lin']['b'],
                                          out_dtype=F32)
        return PointTensor(z1.F.astype(F32) + delta, z1.C, z1.grid_coords)

    def apply_attention(self, p, F, C):
        """Returns F + proj(attention(LN(F))) — residual fused into proj."""
        nheads = p['nheads']
        M, nf = F.shape
        d = nf // nheads
        xn = pallas_layernorm(F, p['ln']['g'], p['ln']['b'])         # bf16
        qkv = pallas_matmul(xn, p['qkv']['w'], p['qkv']['b'])        # bf16

        # pad per-batch rows into a lane-dense [B, S, 3*nf] slab
        batches = np.unique(C[:, 3])
        B = len(batches)
        counts = [int(np.sum(C[:, 3] == b)) for b in batches]
        S = max(8, ((max(counts) + 7) // 8) * 8)
        idx = np.zeros((B, S), np.int32)
        mask = np.zeros((B, 1, S), np.float32)
        inv = np.zeros((M,), np.int32)
        for bi, b in enumerate(batches):
            rows = np.nonzero(C[:, 3] == b)[0]
            n = rows.shape[0]
            idx[bi, :n] = rows
            mask[bi, 0, :n] = 1.0
            inv[rows] = bi * S + np.arange(n)

        qkv_p = jnp.take(qkv, jnp.asarray(idx.reshape(-1)),
                         axis=0).reshape(B, S, 3 * nf)
        o = pallas_attention(qkv_p, jnp.asarray(mask), nheads, d,
                             1.0 / math.sqrt(d))                     # [B,S,nf]
        attn_rows = jnp.take(o.reshape(B * S, nf), jnp.asarray(inv), axis=0)
        return pallas_matmul(attn_rows, p['proj']['w'], p['proj']['b'], res=F)

    def apply_embres(self, p, x, emb):
        inp_F = x.F
        nf = p['conv1']['w'].shape[2]
        # FiLM table from the time embedding: SiLU -> Linear -> [B, 2*nf]
        e = pallas_affine_silu_linear(emb, _identity_ss(emb.shape[1]),
                                      p['emb_proj']['w'], p['emb_proj']['b'],
                                      out_dtype=F32)
        film = (jnp.asarray(x.C[:, 3:4].astype(np.int32)),
                e[:, :nf], e[:, nf:])
        # conv1: BN -> SiLU -> sparse conv (FiLM fused into the conv epilogue)
        ss1 = pallas_bn_fold(x.F, p['bn1']['g'], p['bn1']['b'])
        h = pallas_affine_silu(x.F, ss1)
        h = self.apply_spconv(p['conv1'], SparseTensor(h, x.C, x.stride),
                              film=film).F
        # identity path
        id_F = (inp_F if p['idconv'] is None
                else pallas_matmul(inp_F, p['idconv']['w_flat']))
        # conv2: BN -> SiLU -> sparse conv (residual add fused into epilogue)
        ss2 = pallas_bn_fold(h, p['bn2']['g'], p['bn2']['b'])
        h = pallas_affine_silu(h, ss2)
        out_F = self.apply_spconv(p['conv2'], SparseTensor(h, x.C, x.stride),
                                  res=id_F).F
        if p['attn'] is not None:
            out_F = self.apply_attention(p['attn'], out_F, x.C)
        return SparseTensor(out_F, x.C, x.stride)

    def apply_stem(self, p, x, z):
        x = self.apply_spconv(p['conv1'], x)
        ss = pallas_bn_fold(x.F, p['bn']['g'], p['bn']['b'])
        h = pallas_affine_silu(x.F, ss)
        x = self.apply_spconv(p['conv2'], SparseTensor(h, x.C, x.stride))
        z1 = self.voxel_to_point(x, z)
        z1 = self.apply_pointblock(p['point'], z1, z)
        x = self.point_to_voxel(x, z1)
        return x, z1

    def apply_down_stage(self, p, x, z, emb, saved):
        stage_saved = []
        for dblk in p['downs']:
            for rp in dblk['resnets']:
                x = self.apply_embres(rp, x, emb)
                stage_saved.append(x)
            if dblk['add_down']:
                x = self.apply_down_conv(dblk['down'], x)
                stage_saved.append(x)          # down conv output is `saved(...)`
            else:
                x = self.apply_spconv(dblk['down'], x)   # 1x1, not saved
        saved.extend(stage_saved)
        z1 = self.voxel_to_point(x, z)
        z1 = self.apply_pointblock(p['point'], z1, z)
        x = self.point_to_voxel(x, z1)
        return x, z1

    def apply_up_stage(self, p, x, z, emb, saved):
        for ublk in p['ups']:
            for rp in ublk['resnets']:
                skip = saved.pop()
                cat = SparseTensor(jnp.concatenate(
                    [x.F.astype(F32), skip.F.astype(F32)], axis=1),
                    x.C, x.stride)
                x = self.apply_embres(rp, cat, emb)
            if ublk['add_up']:
                x = self.apply_up_conv(ublk['up'], x)
            else:
                x = self.apply_spconv(ublk['up'], x)
        z1 = self.voxel_to_point(x, z)
        z1 = self.apply_pointblock(p['point'], z1, z)
        x = self.point_to_voxel(x, z1)
        return x, z1

    # ---------------- forward ----------------
    def forward(self, inp):
        (x_F, x_C), t = inp
        z = PointTensor(x_F.astype(F32), x_C.astype(F32))
        temb = timestep_embedding(t, self.n_temb)
        emb = self.apply_lin(self.params['emb_mlp'][0], temb)
        emb = self.apply_lin(self.params['emb_mlp'][1], emb)
        x0 = self.initial_voxelize(z)
        x, z = self.apply_stem(self.params['stem'], x0, z)
        saved = [x]
        for dp in self.params['down_stages']:
            x, z = self.apply_down_stage(dp, x, z, emb, saved)
        for up in self.params['up_stages']:
            x, z = self.apply_up_stage(up, x, z, emb, saved)
        p = self.params['out_conv']
        ss = pallas_bn_fold(z.F, p['bn']['g'], p['bn']['b'])
        return pallas_affine_silu_linear(z.F, ss, p['lin']['w'], None,
                                         out_dtype=F32)


# -----------------------------------------------------------------------------
if __name__ == "__main__":
    key = jax.random.PRNGKey(0)
    k1, _ = jax.random.split(key)
    B, N_per = 2, 32
    N = B * N_per
    pts = jax.random.uniform(k1, (N, 3), minval=0.0, maxval=1.2)
    batch_idx = jnp.repeat(jnp.arange(B, dtype=jnp.float32), N_per)[:, None]
    x_C = jnp.concatenate([pts, batch_idx], axis=1)          # [N, 4] (x,y,z,b)
    x_F = pts                                                 # features = xyz
    t = jnp.array([3.0, 7.0], dtype=jnp.float32)              # one timestep / batch

    model = SPVUnetSymmetricPallas()
    out = model.forward(((x_F, x_C), t))
    out = jax.block_until_ready(out)
    assert out.shape == (N, 3)
    assert bool(jnp.all(jnp.isfinite(out)))
    print("KERNEL_OK")
</pallas_src>

<mosaic_0001>
module attributes {stable_mosaic.version = 11 : i64} {
  func.func @_bn_stats_kernel(%arg0: i32, %arg1: memref<2x32xf32, #tpu.memory_space<vmem>>, %arg2: memref<1x32xf32, #tpu.memory_space<vmem>>, %arg3: memref<1x32xf32, #tpu.memory_space<vmem>>, %arg4: memref<2x32xf32, #tpu.memory_space<vmem>>, %arg5: memref<1x32xf32, #tpu.memory_space<vmem>>, %arg6: memref<1x32xf32, #tpu.memory_space<vmem>>) attributes {dimension_semantics = [#tpu.dimension_semantics<arbitrary>], iteration_bounds = array<i64: 1>, scalar_prefetch = 0 : i64, scratch_operands = 2 : i64, tpu.core_type = #tpu.core_type<tc>, window_params = [{transform_indices = @transform_0, window_bounds = array<i64: 2, 32>}, {pipeline_mode = #tpu.pipeline_mode<synchronous>, transform_indices = @transform_1, window_bounds = array<i64: 1, 32>}, {pipeline_mode = #tpu.pipeline_mode<synchronous>, transform_indices = @transform_2, window_bounds = array<i64: 1, 32>}, {pipeline_mode = #tpu.pipeline_mode<synchronous>, transform_indices = @transform_3, window_bounds = array<i64: 2, 32>}]} {
    %c0_i32 = arith.constant 0 : i32
    %0 = arith.cmpi eq, %arg0, %c0_i32 : i32
    %1 = arith.extui %0 : i1 to i32
    %c0_i32_0 = arith.constant 0 : i32
    %2 = arith.cmpi ne, %1, %c0_i32_0 : i32
    scf.if %2 {
      %cst_15 = arith.constant 0.000000e+00 : f32
      %26 = vector.broadcast %cst_15 : f32 to vector<1x32xf32>
      %c0_16 = arith.constant 0 : index
      %c0_17 = arith.constant 0 : index
      %27 = vector.load %arg5[%c0_16, %c0_17] : memref<1x32xf32, #tpu.memory_space<vmem>>, vector<1x32xf32>
      tpu.vector_store %arg5[%c0_16, %c0_17], %26 {strides = array<i32>} : memref<1x32xf32, #tpu.memory_space<vmem>>, vector<1x32xf32>,
      %cst_18 = arith.constant 0.000000e+00 : f32
      %28 = vector.broadcast %cst_18 : f32 to vector<1x32xf32>
      %c0_19 = arith.constant 0 : index
      %c0_20 = arith.constant 0 : index
      %29 = vector.load %arg6[%c0_19, %c0_20] : memref<1x32xf32, #tpu.memory_space<vmem>>, vector<1x32xf32>
      tpu.vector_store %arg6[%c0_19, %c0_20], %28 {strides = array<i32>} : memref<1x32xf32, #tpu.memory_space<vmem>>, vector<1x32xf32>,
    } else {
    }
    %c0 = arith.constant 0 : index
    %c0_1 = arith.constant 0 : index
    %3 = vector.load %arg1[%c0, %c0_1] : memref<2x32xf32, #tpu.memory_space<vmem>>, vector<2x32xf32>
    %4 = tpu.iota {dimensions = array<i32: 0>} : vector<2x32xi32>
    %c2_i32 = arith.constant 2 : i32
    %5 = arith.muli %arg0, %c2_i32 : i32
    %6 = vector.broadcast %5 : i32 to vector<2x32xi32>
    %7 = arith.addi %4, %6 : vector<2x32xi32>
    %c2_i32_2 = arith.constant 2 : i32
    %8 = vector.broadcast %c2_i32_2 : i32 to vector<2x32xi32>
    %9 = arith.cmpi slt, %7, %8 : vector<2x32xi32>
    %cst = arith.constant 0.000000e+00 : f32
    %10 = vector.broadcast %cst : f32 to vector<2x32xf32>
    %11 = arith.select %9, %3, %10 : vector<2x32xi1>, vector<2x32xf32>
    %c0_3 = arith.constant 0 : index
    %c0_4 = arith.constant 0 : index
    %12 = vector.load %arg5[%c0_3, %c0_4] : memref<1x32xf32, #tpu.memory_space<vmem>>, vector<1x32xf32>
    %cst_5 = arith.constant dense<0.000000e+00> : vector<32xf32>
    %13 = vector.multi_reduction <add>, %11, %cst_5 [0] : vector<2x32xf32> to vector<32xf32>
    %14 = vector.shape_cast %13 : vector<32xf32> to vector<1x32xf32>
    %15 = arith.addf %12, %14 : vector<1x32xf32>
    %c0_6 = arith.constant 0 : index
    %c0_7 = arith.constant 0 : index
    %16 = vector.load %arg5[%c0_6, %c0_7] : memref<1x32xf32, #tpu.memory_space<vmem>>, vector<1x32xf32>
    tpu.vector_store %arg5[%c0_6, %c0_7], %15 {strides = array<i32>} : memref<1x32xf32, #tpu.memory_space<vmem>>, vector<1x32xf32>,
    %c0_8 = arith.constant 0 : index
    %c0_9 = arith.constant 0 : index
    %17 = vector.load %arg6[%c0_8, %c0_9] : memref<1x32xf32, #tpu.memory_space<vmem>>, vector<1x32xf32>
    %18 = arith.mulf %11, %11 : vector<2x32xf32>
    %cst_10 = arith.constant dense<0.000000e+00> : vector<32xf32>
    %19 = vector.multi_reduction <add>, %18, %cst_10 [0] : vector<2x32xf32> to vector<32xf32>
    %20 = vector.shape_cast %19 : vector<32xf32> to vector<1x32xf32>
    %21 = arith.addf %17, %20 : vector<1x32xf32>
    %c0_11 = arith.constant 0 : index
    %c0_12 = arith.constant 0 : index
    %22 = vector.load %arg6[%c0_11, %c0_12] : memref<1x32xf32, #tpu.memory_space<vmem>>, vector<1x32xf32>
    tpu.vector_store %arg6[%c0_11, %c0_12], %21 {strides = array<i32>} : memref<1x32xf32, #tpu.memory_space<vmem>>, vector<1x32xf32>,
    %c0_i32_13 = arith.constant 0 : i32
    %23 = arith.cmpi eq, %arg0, %c0_i32_13 : i32
    %24 = arith.extui %23 : i1 to i32
    %c0_i32_14 = arith.constant 0 : i32
    %25 = arith.cmpi ne, %24, %c0_i32_14 : i32
    scf.if %25 {
      %c0_15 = arith.constant 0 : index
      %c0_16 = arith.constant 0 : index
      %26 = vector.load %arg5[%c0_15, %c0_16] : memref<1x32xf32, #tpu.memory_space<vmem>>, vector<1x32xf32>
      %cst_17 = arith.constant 2.000000e+00 : f32
      %27 = vector.broadcast %cst_17 : f32 to vector<1x32xf32>
      %28 = arith.divf %26, %27 : vector<1x32xf32>
      %c0_18 = arith.constant 0 : index
      %c0_19 = arith.constant 0 : index
      %29 = vector.load %arg6[%c0_18, %c0_19] : memref<1x32xf32, #tpu.memory_space<vmem>>, vector<1x32xf32>
      %cst_20 = arith.constant 2.000000e+00 : f32
      %30 = vector.broadcast %cst_20 : f32 to vector<1x32xf32>
      %31 = arith.divf %29, %30 : vector<1x32xf32>
      %32 = arith.mulf %28, %28 : vector<1x32xf32>
      %33 = arith.subf %31, %32 : vector<1x32xf32>
      %cst_21 = arith.constant 0.000000e+00 : f32
      %34 = vector.broadcast %cst_21 : f32 to vector<1x32xf32>
      %35 = arith.maximumf %33, %34 : vector<1x32xf32>
      %c0_22 = arith.constant 0 : index
      %c0_23 = arith.constant 0 : index
      %36 = vector.load %arg2[%c0_22, %c0_23] : memref<1x32xf32, #tpu.memory_space<vmem>>, vector<1x32xf32>
      %cst_24 = arith.constant 9.99999974E-6 : f32
      %37 = vector.broadcast %cst_24 : f32 to vector<1x32xf32>
      %38 = arith.addf %35, %37 : vector<1x32xf32>
      %39 = math.rsqrt %38 : vector<1x32xf32>
      %40 = arith.mulf %36, %39 : vector<1x32xf32>
      %c0_25 = arith.constant 0 : index
      %c0_26 = arith.constant 0 : index
      %41 = vector.load %arg3[%c0_25, %c0_26] : memref<1x32xf32, #tpu.memory_space<vmem>>, vector<1x32xf32>
      %42 = arith.mulf %28, %40 : vector<1x32xf32>
      %43 = arith.subf %41, %42 : vector<1x32xf32>
      %44 = tpu.concatenate %40, %43 in 0 : vector<1x32xf32>, vector<1x32xf32> -> vector<2x32xf32>
      %c0_27 = arith.constant 0 : index
      %c0_28 = arith.constant 0 : index
      %45 = vector.load %arg4[%c0_27, %c0_28] : memref<2x32xf32, #tpu.memory_space<vmem>>, vector<2x32xf32>
      tpu.vector_store %arg4[%c0_27, %c0_28], %44 {strides = array<i32>} : memref<2x32xf32, #tpu.memory_space<vmem>>, vector<2x32xf32>,
    } else {
    }
    return
  }
  func.func @transform_0(%arg0: i32) -> (i32, i32) {
    %c0_i32 = arith.constant 0 : i32
    %c0_i32_0 = arith.constant 0 : i32
    return %arg0, %c0_i32 : i32, i32
  }
  func.func @transform_1(%arg0: i32) -> (i32, i32) {
    %c0_i32 = arith.constant 0 : i32
    %c0_i32_0 = arith.constant 0 : i32
    %c0_i32_1 = arith.constant 0 : i32
    return %c0_i32, %c0_i32_0 : i32, i32
  }
  func.func @transform_2(%arg0: i32) -> (i32, i32) {
    %c0_i32 = arith.constant 0 : i32
    %c0_i32_0 = arith.constant 0 : i32
    %c0_i32_1 = arith.constant 0 : i32
    return %c0_i32, %c0_i32_0 : i32, i32
  }
  func.func @transform_3(%arg0: i32) -> (i32, i32) {
    %c0_i32 = arith.constant 0 : i32
    %c0_i32_0 = arith.constant 0 : i32
    %c0_i32_1 = arith.constant 0 : i32
    return %c0_i32, %c0_i32_0 : i32, i32
  }
}

</mosaic_0001>

<bundles_post_ra>
// kernel: tpu_custom_call.1
= control target key start
LH: loop header
LB: loop body
LE: loop exit
PB: predicated region body
PF: predicated region fallthrough
CT: control target
= control target key end

     0   :  { %8 = vsyncpa [#allocation5], 0  ;;  %s221_s0 = inlined_call_operand.hbm [shape: f32[2,32], index: 0, kind: input, shape index: {}]   ;;  %s222_s1 = inlined_call_operand.vmem [shape: f32[1,32], index: 1, kind: input, shape index: {}]   ;;  %s223_s2 = inlined_call_operand.vmem [shape: f32[1,32], index: 2, kind: input, shape index: {}]   ;;  %s224_s3 = inlined_call_operand.hbm [shape: f32[2,32], index: 3, kind: output, shape index: {}]  }
   0x1   :  { %9 = vsyncpa [#allocation6], 0  ;;  %s161_s12 = smov [#allocation4]   ;;  %s113_s16 = scalar_lea.hbm %s221_s0, 32 }
   0x2   :  { %s16_s13 = sshll.u32 %s161_s12, 4  ;;  %p114_p0 = scmp.ne.s32.totalorder %s221_s0, %s113_s16  ;;  %s17_s13 = int_to_ptr.vmem [resolvable:$true] %s16_s13 }
   0x3   :  { %p117_p1 = scmp.lt.u32.totalorder %s113_s16, %s221_s0 }
   0x5   :  { %p119_p2 = pnand %p117_p1, %p114_p0 }
   0x7   :  { %122 = shalt.err (!%p119_p2)
}
   0x8   :  { %s123_s21 = scalar_lea.vmem %s17_s13, 32  ;;  %p128_p4 = scmp.lt.s32.totalorder %s17_s13, %s17_s13 }
   0x9   :  { %p124_p3 = scmp.ne.s32.totalorder %s17_s13, %s123_s21  ;;  %p129_p5 = scmp.lt.s32.totalorder %s123_s21, %s123_s21 }
   0xb   :  { %p130_p6 = por %p129_p5, %p128_p4 }
   0xd   :  { %p131_p7 = pnand %p130_p6, %p124_p3 }
   0xf   :  { %134 = shalt.err (!%p131_p7)
}
  0x10   :  { %19 = dma.hbm_to_vmem [thread:$0]  %s221_s0, 32, %s17_s13, [#allocation5]  }
  0x11   :  { %157 = dma.done.wait [#allocation5], 32  }
  0x12   :  { %158 = vsyncadd [#allocation5], 4294967264  ;;  %vm31_vm0 = vcmask 253952   ;;  %v162_v0 = vmov 0.0   ;;  %vm43_vm1 = vcmask 254976   ;;  %v84_v29 = vlaneseq  ;;  %s163_s27 = smov [#allocation7]  }
  0x13   :  { %32 = vst.msk [vmem:[#allocation2] sm:$0x1] %vm31_vm0, %v162_v0  ;;  %33 = vst.msk [vmem:[#allocation3] sm:$0x1] %vm31_vm0, %v162_v0  ;;  %v107_v1 = vld [vmem:[#allocation4] sm:$0x3] }
  0x14   :  { %v44_v2 = vsel %vm43_vm1, %v107_v1, 0.0  ;;  %v55_v3 = vmul.f32 %v107_v1, %v107_v1  ;;  %v76_v30 = vld [vmem:[%s222_s1] sm:$0x1]  ;;  %v85_v31 = vshrl.u32 %v84_v29, 7  ;;  %s98_s28 = sshll.u32 %s163_s27, 4  ;;  %vm89_vm2 = vcmask 1040384   ;;  %s99_s28 = int_to_ptr.vmem [resolvable:$true] %s98_s28 }
  0x15   :  { %v45_v4 = vrot.slane %v44_v2, 4  ;;  %v80_v34 = vld [vmem:[%s223_s2] sm:$0x1]  ;;  %s135_s29 = scalar_lea.vmem %s99_s28, 32  ;;  %p140_p9 = scmp.lt.s32.totalorder %s99_s28, %s99_s28 }
  0x16   :  { %v56_v5 = vsel %vm43_vm1, %v55_v3, 0.0  ;;  %v86_v36 = vsub.s32 0, %v85_v31  ;;  %p136_p8 = scmp.ne.s32.totalorder %s99_s28, %s135_s29  ;;  %p141_p10 = scmp.lt.s32.totalorder %s135_s29, %s135_s29 }
  0x17   :  { %v46_v6 = vadd.f32 %v45_v4, %v44_v2  ;;  %v57_v7 = vrot.slane %v56_v5, 4 }
  0x18   :  { %p142_p11 = por %p141_p10, %p140_p9 }
  0x19   :  { %v47_v8 = vrot.slane %v46_v6, 2  ;;  %v58_v9 = vadd.f32 %v57_v7, %v56_v5 }
  0x1a   :  { %v42_v14 = vld [vmem:[#allocation2] sm:$0x1]  ;;  %v54_v17 = vld [vmem:[#allocation3] sm:$0x1]  ;;  %p143_p12 = pnand %p142_p11, %p136_p8 }
  0x1b   :  { %v48_v10 = vadd.f32 %v47_v8, %v46_v6  ;;  %v59_v11 = vrot.slane %v58_v9, 2 }
  0x1d   :  { %v49_v12 = vrot.slane %v48_v10, 1  ;;  %v60_v13 = vadd.f32 %v59_v11, %v58_v9 }
  0x1f   :  { %v50_v15 = vadd.f32 %v49_v12, %v48_v10  ;;  %v61_v16 = vrot.slane %v60_v13, 1 }
  0x21   :  { %v51_v18 = vadd.f32 %v50_v15, %v42_v14  ;;  %v62_v19 = vadd.f32 %v61_v16, %v60_v13 }
  0x23   :  { %53 = vst.msk [vmem:[#allocation2] sm:$0x1] %vm31_vm0, %v51_v18  ;;  %v63_v20 = vadd.f32 %v62_v19, %v54_v17 }
  0x25   :  { %64 = vst.msk [vmem:[#allocation3] sm:$0x1] %vm31_vm0, %v63_v20 }
  0x2a   :  { %v68_v21 = vld [vmem:[#allocation2] sm:$0x1] }
  0x2b   :  { %v70_v22 = vmul.f32 0.5, %v68_v21 }
  0x2c   :  { %v71_v23 = vld [vmem:[#allocation3] sm:$0x1] }
  0x2d   :  { %v72_v24 = vmul.f32 0.5, %v71_v23  ;;  %v73_v25 = vmul.f32 %v70_v22, %v70_v22 }
  0x2f   :  { %v74_v26 = vsub.f32 %v72_v24, %v73_v25 }
  0x31   :  { %v75_v27 = vmax.f32 %v74_v26, 0.0 }
  0x33   :  { %v77_v28 = vadd.f32 1e-05, %v75_v27 }
  0x35   :  { %111 = vrsqrt.f32 %v77_v28 }
  0x3f   :  { %v112_v32 = vpop.eup %111 }
  0x40   :  { %v79_v33 = vmul.f32 %v112_v32, %v76_v30 }
  0x42   :  { %v81_v35 = vmul.f32 %v79_v33, %v70_v22 }
  0x44   :  { %v82_v37 = vsub.f32 %v80_v34, %v81_v35 }
  0x46   :  { %v87_v38 = vrot.slane %v82_v37, %v86_v36 }
  0x48   :  { %v90_v39 = vsel %vm89_vm2, %v79_v33, %v87_v38 }
  0x49   :  { %91 = vst.msk [vmem:[#allocation7] sm:$0x3] %vm43_vm1, %v90_v39 }
  0x4a   :  { %146 = shalt.err (!%p143_p12)
}
  0x4b   :  { %s147_s30 = scalar_lea.hbm %s224_s3, 32 }
  0x4c   :  { %p148_p13 = scmp.ne.s32.totalorder %s224_s3, %s147_s30  ;;  %p151_p0 = scmp.lt.u32.totalorder %s147_s30, %s224_s3 }
  0x4e   :  { %p153_p1 = pnand %p151_p0, %p148_p13 }
  0x50   :  { %156 = shalt.err (!%p153_p1)
}
  0x51   :  { %101 = dma.vmem_to_hbm [thread:$0]  %s99_s28, 32, %s224_s3, [#allocation6]  }
  0x52   :  { %159 = dma.done.wait [#allocation6], 32  }
  0x53   :  { %160 = vsyncadd [#allocation6], 4294967264 }
  0x54   :  { %105 = vsyncpa [#allocation5], 1 }
  0x55   :  { %106 = vsyncpa [#allocation6], 1 }

</bundles_post_ra>
